<compile_context>
chip_gen: v5e
topology: v5e:2x2
jax: 0.10.0
libtpu: 0.0.40
codegen_flags: <defaults>
</compile_context>

<pallas_src>
import functools

import jax
import jax.numpy as jnp
from jax.experimental import pallas as pl
from jax.experimental.pallas import tpu as pltpu


# ---------------------------------------------------------------------------
# Kernels
# ---------------------------------------------------------------------------

def _sigmoid(v, approx):
    # exp goes to the EUP; the divide either stays exact (f32 check path) or
    # uses the EUP approximate reciprocal to free VPU issue slots (perf path).
    den = 1.0 + jnp.exp(-v)
    if approx:
        return pl.reciprocal(den, approx=True)
    return 1.0 / den


def linear_kernel(x_ref, wt_ref, bw_ref, h_ref):
    # x_ref: (1, TM, Fp)  wt_ref: (Fp, Fp) pre-transposed  bw_ref: (1, Fp) f32
    # h_ref: (1, TM, Fp)  -> h = x @ W.T + b  (stored in compute dtype)
    h_ref[0] = (
        jnp.dot(x_ref[0], wt_ref[...], preferred_element_type=jnp.float32)
        + bw_ref[...]
    ).astype(h_ref.dtype)


def ggnn_gru_kernel(x_ref, h_ref, adj_ref, wrz_ref, brz_ref, wni_ref, bni_ref,
                    wnh_ref, bnh_ref, o_ref, acc_ref, *, approx_sigmoid=True):
    # x_ref:   (1, TN, Fp)   GRU hidden state rows (original x) of this tile
    # h_ref:   (1, TK, Fp)   precomputed linear output, streamed over K
    # adj_ref: (1, TN, TK)   adjacency tile
    # wrz_ref: (2Fp, 2Fp)    [[Wr_i^T Wz_i^T],[Wr_h^T Wz_h^T]]   (merged r/z)
    # brz_ref: (1, 2Fp) f32  [b_ih_r+b_hh_r | b_ih_z+b_hh_z]
    # wni_ref/wnh_ref: (Fp, Fp)  n-gate input / hidden weights (transposed)
    # bni_ref/bnh_ref: (1, Fp) f32
    # o_ref:   (1, TN, Fp)
    # acc_ref: (TN, Fp) f32  accumulator for m = adj @ h across the K axis
    k = pl.program_id(2)

    @pl.when(k == 0)
    def _():
        acc_ref[...] = jnp.zeros_like(acc_ref)

    # m partial sum for this K tile (f32 accumulation on the MXU).
    acc_ref[...] += jnp.dot(adj_ref[0], h_ref[0],
                            preferred_element_type=jnp.float32)

    @pl.when(k == pl.num_programs(2) - 1)
    def _():
        Fp = o_ref.shape[2]
        cd = x_ref.dtype
        m = acc_ref[...]
        m_cd = m.astype(cd)
        h_prev = x_ref[0]                                   # (TN, Fp), cd

        # Merged r/z GEMM: K = 2*Fp fills the MXU depth on v6e/v7x.
        mh = jnp.concatenate([m_cd, h_prev], axis=-1)       # (TN, 2Fp)
        rz = jnp.dot(mh, wrz_ref[...],
                     preferred_element_type=jnp.float32) + brz_ref[...]
        r = _sigmoid(rz[:, :Fp], approx_sigmoid)
        z = _sigmoid(rz[:, Fp:], approx_sigmoid)

        gi_n = jnp.dot(m_cd, wni_ref[...],
                       preferred_element_type=jnp.float32) + bni_ref[...]
        gh_n = jnp.dot(h_prev, wnh_ref[...],
                       preferred_element_type=jnp.float32) + bnh_ref[...]
        n = jnp.tanh(gi_n + r * gh_n)

        h_new = (1.0 - z) * n + z * h_prev.astype(jnp.float32)
        o_ref[0] = h_new.astype(o_ref.dtype)


# ---------------------------------------------------------------------------
# Wrapper helpers
# ---------------------------------------------------------------------------

def _round_up(v, m):
    return ((v + m - 1) // m) * m


def _tile(np_):
    # np_ is always a multiple of 128; pick the largest nice tile that divides.
    for t in (512, 256, 128):
        if np_ % t == 0:
            return t
    return 128


def _pad2(a, rows, cols):
    return jnp.pad(a, ((0, rows - a.shape[0]), (0, cols - a.shape[1])))


def _pack_rz_weights(W_ih, W_hh, F, Fp, dtype):
    # PyTorch GRUCell stacks gates (r | z | n) along dim 0 of W_ih / W_hh.
    wr_i, wz_i = W_ih[:F].T, W_ih[F:2 * F].T        # (in, out)
    wr_h, wz_h = W_hh[:F].T, W_hh[F:2 * F].T
    top = jnp.concatenate([_pad2(wr_i, Fp, Fp), _pad2(wz_i, Fp, Fp)], axis=1)
    bot = jnp.concatenate([_pad2(wr_h, Fp, Fp), _pad2(wz_h, Fp, Fp)], axis=1)
    return jnp.concatenate([top, bot], axis=0).astype(dtype)     # (2Fp, 2Fp)


def _pack_rz_bias(b_ih, b_hh, F, Fp):
    br = jnp.pad(b_ih[:F] + b_hh[:F], (0, Fp - F))
    bz = jnp.pad(b_ih[F:2 * F] + b_hh[F:2 * F], (0, Fp - F))
    return jnp.concatenate([br, bz]).reshape(1, 2 * Fp).astype(jnp.float32)


def _default_vmem_limit():
    cap = None
    try:
        info = pltpu.get_tpu_info()
        cap = getattr(info, "vmem_capacity_bytes", None)
    except Exception:
        cap = None
    if cap is None:
        cap = 64 * 1024 * 1024                     # conservative (v7x-sized)
    if cap >= 96 * 1024 * 1024:                    # v5e / v6e: 128 MiB physical
        return 96 * 1024 * 1024
    return 40 * 1024 * 1024                        # v7x: 64 MiB per TensorCore


def _const_spec(shape, nbuf):
    # Constant-index block; optionally single-buffered (pl.Buffered(1)) so it
    # doesn't waste a second VMEM copy.  Falls back cleanly on older jax.
    index_map = lambda *_: (0,) * len(shape)
    if nbuf is not None and hasattr(pl, "Buffered"):
        try:
            return pl.BlockSpec(shape, index_map,
                                pipeline_mode=pl.Buffered(buffer_count=nbuf))
        except TypeError:
            pass
    return pl.BlockSpec(shape, index_map)


# ---------------------------------------------------------------------------
# Public entry point
# ---------------------------------------------------------------------------

def ggnn(x, adj, W, b, W_ih, W_hh, b_ih, b_hh, *,
         compute_dtype=jnp.bfloat16, vmem_limit_bytes=None,
         single_buffer_weights=True):
    """GGNN forward.

    x:    (B, N, F)   node features (F == n_in == n_out, required by the GRU)
    adj:  (B, N, N)
    W:    (F, F), b: (F,)                             nn.Linear params
    W_ih/W_hh: (3F, F), b_ih/b_hh: (3F,)               nn.GRUCell params (r|z|n)
    compute_dtype: operand dtype for MXU streams (bf16 default); accumulation
                   and the gate epilogue stay in f32.
    """
    B, N, F_in = x.shape
    F = W.shape[0]
    assert W.shape == (F, F_in) and F_in == F, \
        "GGNN requires n_in_feature == n_out_feature (GRU hidden state is x)"
    assert adj.shape == (B, N, N)

    if vmem_limit_bytes is None:
        vmem_limit_bytes = _default_vmem_limit()

    cd = compute_dtype
    Fp = _round_up(F, 128)
    Np = _round_up(N, 128)

    # ---- wrapper-side layout prep: zero-pad to lane-dense shapes, cast ----
    x_p = jnp.pad(x, ((0, 0), (0, Np - N), (0, Fp - F))).astype(cd)
    adj_p = jnp.pad(adj, ((0, 0), (0, Np - N), (0, Np - N))).astype(cd)

    wt_p = _pad2(W.T, Fp, Fp).astype(cd)                               # (in, out)
    bw_p = jnp.pad(b, (0, Fp - F)).reshape(1, Fp).astype(jnp.float32)

    wrz_p = _pack_rz_weights(W_ih, W_hh, F, Fp, cd)                    # (2Fp, 2Fp)
    brz_p = _pack_rz_bias(b_ih, b_hh, F, Fp)                           # (1, 2Fp)
    wni_p = _pad2(W_ih[2 * F:].T, Fp, Fp).astype(cd)                   # (Fp, Fp)
    wnh_p = _pad2(W_hh[2 * F:].T, Fp, Fp).astype(cd)
    bni_p = jnp.pad(b_ih[2 * F:], (0, Fp - F)).reshape(1, Fp).astype(jnp.float32)
    bnh_p = jnp.pad(b_hh[2 * F:], (0, Fp - F)).reshape(1, Fp).astype(jnp.float32)

    TN = _tile(Np)          # adj row tile (output rows)
    TK = _tile(Np)          # adj contraction tile
    TM = TN                 # row tile for the linear kernel

    cparams2 = pltpu.CompilerParams(
        dimension_semantics=("parallel", "parallel"),
        vmem_limit_bytes=vmem_limit_bytes)
    cparams3 = pltpu.CompilerParams(
        dimension_semantics=("parallel", "parallel", "arbitrary"),
        vmem_limit_bytes=vmem_limit_bytes)

    kernel = functools.partial(ggnn_gru_kernel,
                               approx_sigmoid=(cd != jnp.float32))

    def run(nbuf):
        # (1) h = x @ W.T + b, tiled over (batch, rows).
        h_p = pl.pallas_call(
            linear_kernel,
            out_shape=jax.ShapeDtypeStruct((B, Np, Fp), cd),
            grid_spec=pltpu.PrefetchScalarGridSpec(
                num_scalar_prefetch=0,
                grid=(B, Np // TM),
                in_specs=[
                    pl.BlockSpec((1, TM, Fp), lambda bi, ti: (bi, ti, 0)),
                    _const_spec((Fp, Fp), nbuf),
                    _const_spec((1, Fp), nbuf),
                ],
                out_specs=pl.BlockSpec((1, TM, Fp), lambda bi, ti: (bi, ti, 0)),
            ),
            compiler_params=cparams2,
        )(x_p, wt_p, bw_p)

        # (2) m = adj @ h (K-tiled, f32 accumulator) fused with the GRU cell.
        return pl.pallas_call(
            kernel,
            out_shape=jax.ShapeDtypeStruct((B, Np, Fp), x.dtype),
            grid_spec=pltpu.PrefetchScalarGridSpec(
                num_scalar_prefetch=0,
                grid=(B, Np // TN, Np // TK),
                in_specs=[
                    pl.BlockSpec((1, TN, Fp), lambda bi, ti, ki: (bi, ti, 0)),   # x rows
                    pl.BlockSpec((1, TK, Fp), lambda bi, ti, ki: (bi, ki, 0)),   # h K-tile
                    pl.BlockSpec((1, TN, TK), lambda bi, ti, ki: (bi, ti, ki)),  # adj tile
                    _const_spec((2 * Fp, 2 * Fp), nbuf),                         # W_rz
                    _const_spec((1, 2 * Fp), nbuf),                              # b_rz
                    _const_spec((Fp, Fp), nbuf),                                 # W_n input
                    _const_spec((1, Fp), nbuf),                                  # b_n input
                    _const_spec((Fp, Fp), nbuf),                                 # W_n hidden
                    _const_spec((1, Fp), nbuf),                                  # b_n hidden
                ],
                out_specs=pl.BlockSpec((1, TN, Fp), lambda bi, ti, ki: (bi, ti, 0)),
                scratch_shapes=[pltpu.VMEM((TN, Fp), jnp.float32)],
            ),
            compiler_params=cparams3,
        )(x_p, h_p, adj_p, wrz_p, brz_p, wni_p, bni_p, wnh_p, bnh_p)

    if single_buffer_weights:
        try:
            out_p = run(1)
        except Exception:
            # pl.Buffered(1) not supported by this jax/libtpu build — retry
            # with default double-buffered weight blocks (only costs VMEM).
            out_p = run(None)
    else:
        out_p = run(None)

    return out_p[:, :N, :F]


# ---------------------------------------------------------------------------
# Pure-JAX reference (matches the PyTorch GGNN.forward)
# ---------------------------------------------------------------------------

def ggnn_reference(x, adj, W, b, W_ih, W_hh, b_ih, b_hh):
    hp = jax.lax.Precision.HIGHEST
    B, N, _ = x.shape
    F = W.shape[0]
    m = jnp.einsum('bjk,bkl->bjl', adj,
                   jnp.dot(x, W.T, precision=hp) + b, precision=hp)
    m2 = m.reshape(-1, F)
    h = x.reshape(-1, F)
    gi = jnp.dot(m2, W_ih.T, precision=hp) + b_ih
    gh = jnp.dot(h, W_hh.T, precision=hp) + b_hh
    i_r, i_z, i_n = jnp.split(gi, 3, axis=-1)
    h_r, h_z, h_n = jnp.split(gh, 3, axis=-1)
    r = jax.nn.sigmoid(i_r + h_r)
    z = jax.nn.sigmoid(i_z + h_z)
    n = jnp.tanh(i_n + r * h_n)
    h_new = (1.0 - z) * n + z * h
    return h_new.reshape(B, N, F)


if __name__ == "__main__":
    # Small shapes consistent with the module (GGNN needs n_in == n_out).
    B, N, F = 2, 16, 32

    key = jax.random.PRNGKey(0)
    kx, kadj, kw, kb, kih, khh, kbih, kbhh = jax.random.split(key, 8)

    x = jax.random.normal(kx, (B, N, F), dtype=jnp.float32)
    adj = jax.random.uniform(kadj, (B, N, N), dtype=jnp.float32)

    # Deterministic PyTorch-style init: U(-1/sqrt(fan_in), 1/sqrt(fan_in)).
    bound = 1.0 / (F ** 0.5)
    W = jax.random.uniform(kw, (F, F), minval=-bound, maxval=bound,
                           dtype=jnp.float32)
    b = jax.random.uniform(kb, (F,), minval=-bound, maxval=bound,
                           dtype=jnp.float32)
    W_ih = jax.random.uniform(kih, (3 * F, F), minval=-bound, maxval=bound,
                              dtype=jnp.float32)
    W_hh = jax.random.uniform(khh, (3 * F, F), minval=-bound, maxval=bound,
                              dtype=jnp.float32)
    b_ih = jax.random.uniform(kbih, (3 * F,), minval=-bound, maxval=bound,
                              dtype=jnp.float32)
    b_hh = jax.random.uniform(kbhh, (3 * F,), minval=-bound, maxval=bound,
                              dtype=jnp.float32)

    ref = ggnn_reference(x, adj, W, b, W_ih, W_hh, b_ih, b_hh)

    # Strict check on the exact f32 compute path.
    out_f32 = jax.block_until_ready(
        ggnn(x, adj, W, b, W_ih, W_hh, b_ih, b_hh, compute_dtype=jnp.float32))
    assert out_f32.shape == (B, N, F)
    assert jnp.allclose(out_f32, ref, atol=1e-4, rtol=1e-4), "f32 mismatch"

    # Default perf path: bf16 operands, f32 accumulation — check relative error.
    out_bf16 = jax.block_until_ready(ggnn(x, adj, W, b, W_ih, W_hh, b_ih, b_hh))
    assert out_bf16.shape == (B, N, F)
    rel = jnp.linalg.norm(out_bf16 - ref) / jnp.linalg.norm(ref)
    assert rel < 3e-2, f"bf16 path relative error too large: {rel}"

    print("KERNEL_OK")
</pallas_src>

<mosaic_0001>
module attributes {stable_mosaic.version = 11 : i64} {
  func.func @linear_kernel(%arg0: i32, %arg1: i32, %arg2: memref<1x128x128xf32, #tpu.memory_space<vmem>>, %arg3: memref<128x128xf32, #tpu.memory_space<vmem>>, %arg4: memref<1x128xf32, #tpu.memory_space<vmem>>, %arg5: memref<1x128x128xf32, #tpu.memory_space<vmem>>) attributes {dimension_semantics = [#tpu.dimension_semantics<parallel>, #tpu.dimension_semantics<parallel>], iteration_bounds = array<i64: 2, 1>, scalar_prefetch = 0 : i64, scratch_operands = 0 : i64, tpu.core_type = #tpu.core_type<tc>, window_params = [{transform_indices = @transform_0, window_bounds = array<i64: 1, 128, 128>}, {pipeline_mode = #tpu.pipeline_mode<synchronous>, transform_indices = @transform_1, window_bounds = array<i64: 128, 128>}, {pipeline_mode = #tpu.pipeline_mode<synchronous>, transform_indices = @transform_2, window_bounds = array<i64: 1, 128>}, {transform_indices = @transform_3, window_bounds = array<i64: 1, 128, 128>}]} {
    %c0 = arith.constant 0 : index
    %c0_0 = arith.constant 0 : index
    %c0_1 = arith.constant 0 : index
    %0 = vector.load %arg2[%c0, %c0_0, %c0_1] : memref<1x128x128xf32, #tpu.memory_space<vmem>>, vector<1x128x128xf32>
    %1 = vector.shape_cast %0 : vector<1x128x128xf32> to vector<128x128xf32>
    %c0_2 = arith.constant 0 : index
    %c0_3 = arith.constant 0 : index
    %2 = vector.load %arg3[%c0_2, %c0_3] : memref<128x128xf32, #tpu.memory_space<vmem>>, vector<128x128xf32>
    %cst = arith.constant dense<0.000000e+00> : vector<128x128xf32>
    %3 = tpu.matmul %1, %2, %cst {dimension_numbers = #tpu.dot_dimension_numbers<[1], [0], [0], [1], [0, 0, 1, 1], [], []>} : vector<128x128xf32>, vector<128x128xf32>, vector<128x128xf32> -> vector<128x128xf32>
    %c0_4 = arith.constant 0 : index
    %c0_5 = arith.constant 0 : index
    %4 = vector.load %arg4[%c0_4, %c0_5] : memref<1x128xf32, #tpu.memory_space<vmem>>, vector<1x128xf32>
    %5 = vector.broadcast %4 : vector<1x128xf32> to vector<128x128xf32>
    %6 = arith.addf %3, %5 : vector<128x128xf32>
    %c0_6 = arith.constant 0 : index
    %c0_7 = arith.constant 0 : index
    %c0_8 = arith.constant 0 : index
    %7 = vector.load %arg5[%c0_6, %c0_7, %c0_8] : memref<1x128x128xf32, #tpu.memory_space<vmem>>, vector<1x128x128xf32>
    %8 = vector.shape_cast %7 : vector<1x128x128xf32> to vector<128x128xf32>
    %9 = vector.shape_cast %6 : vector<128x128xf32> to vector<1x128x128xf32>
    tpu.vector_store %arg5[%c0_6, %c0_7, %c0_8], %9 {strides = array<i32>} : memref<1x128x128xf32, #tpu.memory_space<vmem>>, vector<1x128x128xf32>,
    return
  }
  func.func @transform_0(%arg0: i32, %arg1: i32) -> (i32, i32, i32) {
    %c0_i32 = arith.constant 0 : i32
    %c0_i32_0 = arith.constant 0 : i32
    return %arg0, %arg1, %c0_i32 : i32, i32, i32
  }
  func.func @transform_1(%arg0: i32, %arg1: i32) -> (i32, i32) {
    %c0_i32 = arith.constant 0 : i32
    %c0_i32_0 = arith.constant 0 : i32
    %c0_i32_1 = arith.constant 0 : i32
    return %c0_i32, %c0_i32_0 : i32, i32
  }
  func.func @transform_2(%arg0: i32, %arg1: i32) -> (i32, i32) {
    %c0_i32 = arith.constant 0 : i32
    %c0_i32_0 = arith.constant 0 : i32
    %c0_i32_1 = arith.constant 0 : i32
    return %c0_i32, %c0_i32_0 : i32, i32
  }
  func.func @transform_3(%arg0: i32, %arg1: i32) -> (i32, i32, i32) {
    %c0_i32 = arith.constant 0 : i32
    %c0_i32_0 = arith.constant 0 : i32
    return %arg0, %arg1, %c0_i32 : i32, i32, i32
  }
}

module attributes {stable_mosaic.version = 11 : i64} {
  func.func @linear_kernel(%arg0: i32, %arg1: i32, %arg2: memref<1x128x128xf32, #tpu.memory_space<vmem>>, %arg3: memref<128x128xf32, #tpu.memory_space<vmem>>, %arg4: memref<1x128xf32, #tpu.memory_space<vmem>>, %arg5: memref<1x128x128xf32, #tpu.memory_space<vmem>>) attributes {dimension_semantics = [#tpu.dimension_semantics<parallel>, #tpu.dimension_semantics<parallel>], iteration_bounds = array<i64: 2, 1>, scalar_prefetch = 0 : i64, scratch_operands = 0 : i64, tpu.core_type = #tpu.core_type<tc>, window_params = [{transform_indices = @transform_0, window_bounds = array<i64: 1, 128, 128>}, {pipeline_mode = #tpu.pipeline_mode<synchronous>, transform_indices = @transform_1, window_bounds = array<i64: 128, 128>}, {pipeline_mode = #tpu.pipeline_mode<synchronous>, transform_indices = @transform_2, window_bounds = array<i64: 1, 128>}, {transform_indices = @transform_3, window_bounds = array<i64: 1, 128, 128>}]} {
    %c0 = arith.constant 0 : index
    %c0_0 = arith.constant 0 : index
    %c0_1 = arith.constant 0 : index
    %0 = vector.load %arg2[%c0, %c0_0, %c0_1] : memref<1x128x128xf32, #tpu.memory_space<vmem>>, vector<1x128x128xf32>
    %1 = vector.shape_cast %0 : vector<1x128x128xf32> to vector<128x128xf32>
    %c0_2 = arith.constant 0 : index
    %c0_3 = arith.constant 0 : index
    %2 = vector.load %arg3[%c0_2, %c0_3] : memref<128x128xf32, #tpu.memory_space<vmem>>, vector<128x128xf32>
    %cst = arith.constant dense<0.000000e+00> : vector<128x128xf32>
    %3 = tpu.matmul %1, %2, %cst {dimension_numbers = #tpu.dot_dimension_numbers<[1], [0], [0], [1], [0, 0, 1, 1], [], []>} : vector<128x128xf32>, vector<128x128xf32>, vector<128x128xf32> -> vector<128x128xf32>
    %c0_4 = arith.constant 0 : index
    %c0_5 = arith.constant 0 : index
    %4 = vector.load %arg4[%c0_4, %c0_5] : memref<1x128xf32, #tpu.memory_space<vmem>>, vector<1x128xf32>
    %5 = vector.broadcast %4 : vector<1x128xf32> to vector<128x128xf32>
    %6 = arith.addf %3, %5 : vector<128x128xf32>
    %c0_6 = arith.constant 0 : index
    %c0_7 = arith.constant 0 : index
    %c0_8 = arith.constant 0 : index
    %7 = vector.load %arg5[%c0_6, %c0_7, %c0_8] : memref<1x128x128xf32, #tpu.memory_space<vmem>>, vector<1x128x128xf32>
    %8 = vector.shape_cast %7 : vector<1x128x128xf32> to vector<128x128xf32>
    %9 = vector.shape_cast %6 : vector<128x128xf32> to vector<1x128x128xf32>
    tpu.vector_store %arg5[%c0_6, %c0_7, %c0_8], %9 {strides = array<i32>} : memref<1x128x128xf32, #tpu.memory_space<vmem>>, vector<1x128x128xf32>,
    return
  }
  func.func @transform_0(%arg0: i32, %arg1: i32) -> (i32, i32, i32) {
    %c0_i32 = arith.constant 0 : i32
    %c0_i32_0 = arith.constant 0 : i32
    return %arg0, %arg1, %c0_i32 : i32, i32, i32
  }
  func.func @transform_1(%arg0: i32, %arg1: i32) -> (i32, i32) {
    %c0_i32 = arith.constant 0 : i32
    %c0_i32_0 = arith.constant 0 : i32
    %c0_i32_1 = arith.constant 0 : i32
    return %c0_i32, %c0_i32_0 : i32, i32
  }
  func.func @transform_2(%arg0: i32, %arg1: i32) -> (i32, i32) {
    %c0_i32 = arith.constant 0 : i32
    %c0_i32_0 = arith.constant 0 : i32
    %c0_i32_1 = arith.constant 0 : i32
    return %c0_i32, %c0_i32_0 : i32, i32
  }
  func.func @transform_3(%arg0: i32, %arg1: i32) -> (i32, i32, i32) {
    %c0_i32 = arith.constant 0 : i32
    %c0_i32_0 = arith.constant 0 : i32
    return %arg0, %arg1, %c0_i32 : i32, i32, i32
  }
}

</mosaic_0001>

<bundles_post_ra>
// kernel: tpu_custom_call.1
= control target key start
LH: loop header
LB: loop body
LE: loop exit
PB: predicated region body
PF: predicated region fallthrough
CT: control target
= control target key end

     0   :  { %s977_s0 = inlined_call_operand.hbm [shape: f32[2,128,128], index: 0, kind: input, shape index: {}]   ;;  %s978_s1 = inlined_call_operand.hbm [shape: f32[128,128], index: 1, kind: input, shape index: {}]   ;;  %s979_s2 = inlined_call_operand.vmem [shape: f32[1,128], index: 2, kind: input, shape index: {}]   ;;  %s980_s3 = inlined_call_operand.hbm [shape: f32[2,128,128], index: 3, kind: output, shape index: {}]  }
   0x1   :  { %982 = sst [smem:[#allocation11_spill]] %s978_s1 }
   0x2   :  { %8 = vsyncpa [#allocation3], 0 }
   0x3   :  { %10 = vsyncpa [#allocation3 + $0x1], 0 }
   0x4   :  { %11 = vsyncpa [#allocation6], 0 }
   0x5   :  { %12 = vsyncpa [#allocation4], 0 }
   0x6   :  { %14 = vsyncpa [#allocation4 + $0x1], 0  ;;  %s778_s12 = smov 0   ;;  %s780_s13 = smov 0  }
   0x7   :  { %s782_s14 = smov 0   ;;  %s784_s15 = smov 0  }
   0x8   :  { %s786_s16 = smov 0   ;;  %s788_s17 = smov 0  }
   0x9 LB: > { %s460_s18 = sadd.s32 4294967295, %s751_s17   ;;  %s461_s19 = sadd.s32 4294967294, %s751_s17   ;;  %s751_s17 = sphi %s788_s17, %s20_s17   ;;  %s747_s16 = sphi %s786_s16, %s996_s16   ;;  %s743_s15 = sphi %s784_s15, %s995_s15   ;;  %s739_s14 = sphi %s782_s14, %s994_s14   ;;  %s735_s13 = sphi %s780_s13, %s993_s13   ;;  %s731_s12 = sphi %s778_s12, %s992_s12  }
   0xa   : > { %p54_p0 = scmp.ne.s32.totalorder %s735_s13, %s731_s12  ;;  %p812_p1 = scmp.eq.s32.totalorder %s460_s18, 0 }
   0xb   : > { %p816_p2 = scmp.eq.s32.totalorder %s460_s18, 1  ;;  %p128_p3 = scmp.eq.s32.totalorder %s461_s19, 1 }
   0xc   : > { %p822_p4 = por %p812_p1, %p54_p0  ;;  %p462_p5 = scmp.ge.s32.totalorder %s751_s17, 1 }
   0xd   : > { %p827_p6 = por %p128_p3, %p54_p0  ;;  %p135_p7 = scmp.lt.s32.totalorder %s751_s17, 3 }
   0xe   : > { %s987_s1 = sld [smem:[#allocation11_spill]]  ;;  %s753_s28 = smov [#allocation5]  }
   0xf   : > { %p835_p8 = pnand %p462_p5, %p135_p7  ;;  %s148_s29 = sshll.u32 %s753_s28, 4  ;;  %s149_s29 = int_to_ptr.vmem [resolvable:$true] %s148_s29 }
  0x10   : > { %p464_p11 = scmp.ge.s32.totalorder %s751_s17, 2  ;;  %s981_s30 = smov 128  }
  0x11   : > { %p535_p9 = pneg %p835_p8  ;;  %s755_s4 = smov 8  }
  0x12   : > { %s32_s5 = sadd.s32 1, %s747_s16  ;;  %s41_s6 = sadd.s32 1, %s739_s14 }
  0x13   : > { %p536_p10 = pnand %p535_p9, %p812_p1  ;;  %p34_p12 = scmp.ge.s32.totalorder %s32_s5, 2 }
  0x14   : > { %s146_s26 = sshll.u32 %s987_s1, 4  ;;  %p48_p13 = scmp.ne.s32.totalorder %s739_s14, %s735_s13  ;;  %s147_s26 = int_to_ptr.hbm [resolvable:$true] %s146_s26 }
  0x15   : > { %538 = dma.hbm_to_vmem [thread:$0]  (!%p536_p10), %s147_s26, 2048, %s149_s29, [#allocation6], %s981_s30, %s981_s30, %s755_s4  }
  0x16   : > { %p49_p0 = scmp.eq.s32.totalorder %s751_s17, 0  ;;  %s998_s5 = smov (%p34_p12, %s32_s5), 0 }
  0x17   : > { %p860_p5 = por %p816_p2, %p48_p13  ;;  %s36_s9 = ssub.s32 %s747_s16, %s998_s5 }
  0x18   : > { %p854_p3 = por %p49_p0, %p48_p13  ;;  %p548_p7 = scmp.lt.s32.totalorder %s751_s17, 2 }
  0x19   : > { %p39_p9 = scmp.eq.s32.totalorder %s36_s9, 0  ;;  %s165_s10 = sand.u32 1, %s739_s14  }
  0x1a   : > { %s465_s11 = sshll.u32 %s165_s10, 7  ;;  %s477_s19 = sshll.u32 %s747_s16, 7 }
  0x1b   : > { %s869_s18 = scalar_select %p39_p9, %s739_s14, %s41_s6  }
  0x1c   : > { %s176_s26 = scalar_lea.hbm %s977_s0, %s477_s19  ;;  %s169_s28 = scalar_lea.vmem [#allocation2], %s465_s11 }
  0x1d   : > { %s179_s29 = sshll.u32 %s169_s28, 4  ;;  %s177_s21 = sshll.u32 %s176_s26, 4  ;;  %s180_s29 = int_to_ptr.vmem [resolvable:$true] %s179_s29  ;;  %s178_s21 = int_to_ptr.hbm [resolvable:$true] %s177_s21 }
  0x1e   : > { %p540_p2 = pnand %p548_p7, %p854_p3  ;;  %s166_s30 = scalar_lea.sflag [#allocation3], %s165_s10 }
  0x1f   : > { %s991_s1 = smov 128   ;;  %191 = sbr.rel (%p835_p8) target bundleno = 234 (0xea), region = 32 }
  0x20   : > { %542 = dma.hbm_to_vmem [thread:$0]  (!%p540_p2), %s178_s21, 2048, %s180_s29, %s166_s30, %s991_s1, %s991_s1, %s755_s4  }
  0x21   : > { %s883_s6 = sand.u32 (!%p835_p8), 1, %s735_s13  }
  0x22   : > { %s469_s9 = sshll.u32 (!%p835_p8), %s883_s6, 7  ;;  %s194_s11 = scalar_lea.sflag (!%p835_p8), [#allocation3], %s883_s6 }
  0x23   : > { %s889_s7 = scalar_lea.vmem (!%p835_p8), [#allocation2], %s469_s9 }
  0x24   : > { %718 = dma.done.wait (%p822_p4), %s194_s11, 2048  }
  0x25   : > { %720 = vsyncadd (%p822_p4), %s194_s11, 4294965248 }
  0x26   : > { %722 = dma.done.wait (%p812_p1), [#allocation6], 2048  }
  0x27   : > { %724 = vsyncadd (%p812_p1), [#allocation6], 4294965248  ;;  %v259_v0 = vld [vmem:[#allocation5 + $0x78] sm:$0xff]  ;;  %v258_v1 = vld [vmem:[#allocation5 + $0x70] sm:$0xff]  ;;  %s920_s22 = scalar_lea.vmem [#allocation7], %s469_s9  ;;  %s478_s27 = sshll.u32 %s743_s15, 7 }
  0x28   : > { %480 = vmatpush.msra.mxu2 %v259_v0  ;;  %481 = vmatpush.msra.mxu3 %v259_v0  ;;  %v257_v2 = vld [vmem:[#allocation5 + $0x68] sm:$0xff]  ;;  %v256_v3 = vld [vmem:[#allocation5 + $0x60] sm:$0xff]  ;;  %v255_v4 = vld [vmem:[#allocation5 + $0x58] sm:$0xff]  ;;  %s359_s10 = scalar_lea.hbm %s980_s3, %s478_s27  ;;  %s360_s19 = sshll.u32 %s920_s22, 4  ;;  %s361_s19 = int_to_ptr.vmem [resolvable:$true] %s360_s19 }
  0x29   : > { %264 = vmatpush.msra.mxu0 %v259_v0  ;;  %479 = vmatpush.msra.mxu1 %v259_v0  ;;  %v254_v5 = vld [vmem:[#allocation5 + $0x50] sm:$0xff]  ;;  %v253_v6 = vld [vmem:[#allocation5 + $0x48] sm:$0xff]  ;;  %v252_v7 = vld [vmem:[#allocation5 + $0x40] sm:$0xff]  ;;  %s362_s24 = sshll.u32 %s359_s10, 4  ;;  %s346_s15 = scalar_lea.sflag [#allocation4], %s883_s6  ;;  %s363_s24 = int_to_ptr.hbm [resolvable:$true] %s362_s24 }
  0x2a   : > { %483 = vmatpush.msra.mxu2 %v258_v1  ;;  %484 = vmatpush.msra.mxu3 %v258_v1  ;;  %v251_v8 = vld [vmem:[#allocation5 + $0x38] sm:$0xff]  ;;  %v250_v9 = vld [vmem:[#allocation5 + $0x30] sm:$0xff]  ;;  %v249_v10 = vld [vmem:[#allocation5 + $0x28] sm:$0xff]  ;;  %s679_s25 = sshra.s32 %s363_s24, 4  ;;  %s685_s21 = scalar_lea.hbm %s980_s3, 256  ;;  %s680_s25 = int_to_ptr.hbm [resolvable:$true] %s679_s25 }
  0x2b   : > { %265 = vmatpush.msra.mxu0 %v258_v1  ;;  %482 = vmatpush.msra.mxu1 %v258_v1  ;;  %v248_v11 = vld [vmem:[#allocation5 + $0x20] sm:$0xff]  ;;  %v247_v12 = vld [vmem:[#allocation5 + $0x18] sm:$0xff]  ;;  %v246_v13 = vld [vmem:[#allocation5 + $0x10] sm:$0xff]  ;;  %s681_s26 = scalar_lea.hbm %s680_s25, 128  ;;  %p686_p10 = scmp.lt.s32.totalorder %s680_s25, %s980_s3 }
  0x2c   : > { %486 = vmatpush.msra.mxu2 %v257_v2  ;;  %487 = vmatpush.msra.mxu3 %v257_v2  ;;  %v245_v14 = vld [vmem:[#allocation5 + $0x8] sm:$0xff]  ;;  %v244_v15 = vld [vmem:[#allocation5] sm:$0xff]  ;;  %v238_v24 = vld [vmem:[%s889_s7 + $0x50] sm:$0xff]  ;;  %p682_p1 = scmp.ne.s32.totalorder %s680_s25, %s681_s26  ;;  %p687_p12 = scmp.lt.s32.totalorder %s685_s21, %s681_s26 }
  0x2d   : > { %266 = vmatpush.msra.mxu0 %v257_v2  ;;  %485 = vmatpush.msra.mxu1 %v257_v2  ;;  %v236_v16 = vld [vmem:[%s889_s7 + $0x40] sm:$0xff]  ;;  %v237_v20 = vld [vmem:[%s889_s7 + $0x48] sm:$0xff]  ;;  %v242_v25 = vld [vmem:[%s889_s7 + $0x70] sm:$0xff] }
  0x2e   : > { %489 = vmatpush.msra.mxu2 %v256_v3  ;;  %490 = vmatpush.msra.mxu3 %v256_v3  ;;  %v240_v17 = vld [vmem:[%s889_s7 + $0x60] sm:$0xff]  ;;  %v241_v21 = vld [vmem:[%s889_s7 + $0x68] sm:$0xff]  ;;  %v230_v26 = vld [vmem:[%s889_s7 + $0x10] sm:$0xff]  ;;  %p683_p4 = pnand %p682_p1, %p860_p5  ;;  %p688_p13 = por %p687_p12, %p686_p10 }
  0x2f   : > { %267 = vmatpush.msra.mxu0 %v256_v3  ;;  %488 = vmatpush.msra.mxu1 %v256_v3  ;;  %v228_v18 = vld [vmem:[%s889_s7] sm:$0xff]  ;;  %v229_v22 = vld [vmem:[%s889_s7 + $0x8] sm:$0xff]  ;;  %v234_v27 = vld [vmem:[%s889_s7 + $0x30] sm:$0xff] }
  0x30   : > { %492 = vmatpush.msra.mxu2 %v255_v4  ;;  %493 = vmatpush.msra.mxu3 %v255_v4  ;;  %v232_v19 = vld [vmem:[%s889_s7 + $0x20] sm:$0xff]  ;;  %v233_v23 = vld [vmem:[%s889_s7 + $0x28] sm:$0xff]  ;;  %v239_v28 = vld [vmem:[%s889_s7 + $0x58] sm:$0xff]  ;;  %p684_p8 = pneg %p683_p4 }
  0x31   : > { %268 = vmatpush.msra.mxu0 %v255_v4  ;;  %491 = vmatpush.msra.mxu1 %v255_v4  ;;  %v243_v29 = vld [vmem:[%s889_s7 + $0x78] sm:$0xff]  ;;  %v604_v32 = vld [vmem:[%s979_s2] ss:$0 sm:$0xff] }
  0x32   : > { %495 = vmatpush.msra.mxu2 %v254_v5  ;;  %496 = vmatpush.msra.mxu3 %v254_v5  ;;  %v231_v30 = vld [vmem:[%s889_s7 + $0x18] sm:$0xff]  ;;  %p689_p0 = pnand %p688_p13, %p684_p8 }
  0x33   : > { %269 = vmatpush.msra.mxu0 %v254_v5  ;;  %494 = vmatpush.msra.mxu1 %v254_v5  ;;  %v235_v31 = vld [vmem:[%s889_s7 + $0x38] sm:$0xff] }
  0x34   : > { %498 = vmatpush.msra.mxu2 %v253_v6  ;;  %499 = vmatpush.msra.mxu3 %v253_v6 }
  0x35   : > { %270 = vmatpush.msra.mxu0 %v253_v6  ;;  %497 = vmatpush.msra.mxu1 %v253_v6 }
  0x36   : > { %501 = vmatpush.msra.mxu2 %v252_v7  ;;  %502 = vmatpush.msra.mxu3 %v252_v7 }
  0x37   : > { %271 = vmatpush.msra.mxu0 %v252_v7  ;;  %500 = vmatpush.msra.mxu1 %v252_v7 }
  0x38   : > { %504 = vmatpush.msra.mxu2 %v251_v8  ;;  %505 = vmatpush.msra.mxu3 %v251_v8 }
  0x39   : > { %272 = vmatpush.msra.mxu0 %v251_v8  ;;  %503 = vmatpush.msra.mxu1 %v251_v8 }
  0x3a   : > { %507 = vmatpush.msra.mxu2 %v250_v9  ;;  %508 = vmatpush.msra.mxu3 %v250_v9 }
  0x3b   : > { %273 = vmatpush.msra.mxu0 %v250_v9  ;;  %506 = vmatpush.msra.mxu1 %v250_v9 }
  0x3c   : > { %510 = vmatpush.msra.mxu2 %v249_v10  ;;  %511 = vmatpush.msra.mxu3 %v249_v10 }
  0x3d   : > { %274 = vmatpush.msra.mxu0 %v249_v10  ;;  %509 = vmatpush.msra.mxu1 %v249_v10 }
  0x3e   : > { %513 = vmatpush.msra.mxu2 %v248_v11  ;;  %514 = vmatpush.msra.mxu3 %v248_v11 }
  0x3f   : > { %275 = vmatpush.msra.mxu0 %v248_v11  ;;  %512 = vmatpush.msra.mxu1 %v248_v11 }
  0x40   : > { %516 = vmatpush.msra.mxu2 %v247_v12  ;;  %517 = vmatpush.msra.mxu3 %v247_v12 }
  0x41   : > { %276 = vmatpush.msra.mxu0 %v247_v12  ;;  %515 = vmatpush.msra.mxu1 %v247_v12 }
  0x42   : > { %519 = vmatpush.msra.mxu2 %v246_v13  ;;  %520 = vmatpush.msra.mxu3 %v246_v13 }
  0x43   : > { %277 = vmatpush.msra.mxu0 %v246_v13  ;;  %518 = vmatpush.msra.mxu1 %v246_v13 }
  0x44   : > { %522 = vmatpush.msra.mxu2 %v245_v14  ;;  %523 = vmatpush.msra.mxu3 %v245_v14 }
  0x45   : > { %278 = vmatpush.msra.mxu0 %v245_v14  ;;  %521 = vmatpush.msra.mxu1 %v245_v14 }
  0x46   : > { %525 = vmatpush.msra.mxu2 %v244_v15  ;;  %526 = vmatpush.msra.mxu3 %v244_v15 }
  0x47   : > { %304 = vmatmul.f32.vlgmr.msra.gmra.mxu2 %v236_v16  ;;  %316 = vmatmul.f32.vlgmr.msra.gmra.mxu3 %v240_v17 }
  0x48   : > { %279 = vmatpush.msra.mxu0 %v244_v15  ;;  %524 = vmatpush.msra.mxu1 %v244_v15 }
  0x49   : > { %280 = vmatmul.f32.vlgmr.msra.gmra.mxu0 %v228_v18  ;;  %292 = vmatmul.f32.vlgmr.msra.gmra.mxu1 %v232_v19 }
  0x4f   : > { %307 = vmatmul.f32.gmra.mxu2 %v237_v20  ;;  %319 = vmatmul.f32.gmra.mxu3 %v241_v21 }
  0x51   : > { %283 = vmatmul.f32.gmra.mxu0 %v229_v22  ;;  %295 = vmatmul.f32.gmra.mxu1 %v233_v23 }
  0x57   : > { %310 = vmatmul.f32.gmra.mxu2 %v238_v24  ;;  %322 = vmatmul.f32.gmra.mxu3 %v242_v25 }
  0x59   : > { %286 = vmatmul.f32.gmra.mxu0 %v230_v26  ;;  %298 = vmatmul.f32.gmra.mxu1 %v234_v27 }
  0x5f   : > { %313 = vmatmul.f32.gmra.mxu2 %v239_v28  ;;  %325 = vmatmul.f32.gmra.mxu3 %v243_v29 }
  0x61   : > { %289 = vmatmul.f32.gmra.mxu0 %v231_v30  ;;  %301 = vmatmul.f32.gmra.mxu1 %v235_v31 }
  0xc6   : > { %v281_v33 = vpop.f32.mrf.mxu0  ;;  %v293_v34 = vpop.f32.mrf.mxu1 }
  0xc7   : > { %v282_v35 = vadd.f32 %v604_v32, %v281_v33  ;;  %v294_v36 = vadd.f32 %v604_v32, %v293_v34 }
  0xc9   : > { %329 = vst [vmem:[%s920_s22] sm:$0xff] %v282_v35 }
  0xca   : > { %333 = vst [vmem:[%s920_s22 + $0x20] sm:$0xff] %v294_v36  ;;  %v305_v37 = vpop.f32.mrf.mxu2  ;;  %v317_v38 = vpop.f32.mrf.mxu3 }
  0xcb   : > { %v306_v39 = vadd.f32 %v604_v32, %v305_v37  ;;  %v318_v40 = vadd.f32 %v604_v32, %v317_v38 }
  0xcd   : > { %337 = vst [vmem:[%s920_s22 + $0x40] sm:$0xff] %v306_v39 }
  0xce   : > { %341 = vst [vmem:[%s920_s22 + $0x60] sm:$0xff] %v318_v40  ;;  %v284_v41 = vpop.f32.mrf.mxu0  ;;  %v296_v42 = vpop.f32.mrf.mxu1 }
  0xcf   : > { %v285_v43 = vadd.f32 %v604_v32, %v284_v41  ;;  %v297_v44 = vadd.f32 %v604_v32, %v296_v42 }
  0xd1   : > { %330 = vst [vmem:[%s920_s22 + $0x8] sm:$0xff] %v285_v43 }
  0xd2   : > { %334 = vst [vmem:[%s920_s22 + $0x28] sm:$0xff] %v297_v44  ;;  %v308_v45 = vpop.f32.mrf.mxu2  ;;  %v320_v46 = vpop.f32.mrf.mxu3 }
  0xd3   : > { %v309_v47 = vadd.f32 %v604_v32, %v308_v45  ;;  %v321_v48 = vadd.f32 %v604_v32, %v320_v46 }
  0xd5   : > { %338 = vst [vmem:[%s920_s22 + $0x48] sm:$0xff] %v309_v47 }
  0xd6   : > { %342 = vst [vmem:[%s920_s22 + $0x68] sm:$0xff] %v321_v48  ;;  %v287_v49 = vpop.f32.mrf.mxu0  ;;  %v299_v50 = vpop.f32.mrf.mxu1 }
  0xd7   : > { %v288_v51 = vadd.f32 %v604_v32, %v287_v49  ;;  %v300_v52 = vadd.f32 %v604_v32, %v299_v50 }
  0xd9   : > { %331 = vst [vmem:[%s920_s22 + $0x10] sm:$0xff] %v288_v51 }
  0xda   : > { %335 = vst [vmem:[%s920_s22 + $0x30] sm:$0xff] %v300_v52  ;;  %v311_v53 = vpop.f32.mrf.mxu2  ;;  %v323_v54 = vpop.f32.mrf.mxu3 }
  0xdb   : > { %v312_v55 = vadd.f32 %v604_v32, %v311_v53  ;;  %v324_v56 = vadd.f32 %v604_v32, %v323_v54 }
  0xdd   : > { %339 = vst [vmem:[%s920_s22 + $0x50] sm:$0xff] %v312_v55 }
  0xde   : > { %343 = vst [vmem:[%s920_s22 + $0x70] sm:$0xff] %v324_v56  ;;  %v290_v57 = vpop.f32.mrf.mxu0  ;;  %v302_v58 = vpop.f32.mrf.mxu1 }
  0xdf   : > { %v291_v59 = vadd.f32 %v604_v32, %v290_v57  ;;  %v303_v60 = vadd.f32 %v604_v32, %v302_v58 }
  0xe1   : > { %332 = vst [vmem:[%s920_s22 + $0x18] sm:$0xff] %v291_v59 }
  0xe2   : > { %336 = vst [vmem:[%s920_s22 + $0x38] sm:$0xff] %v303_v60  ;;  %v314_v61 = vpop.f32.mrf.mxu2  ;;  %v326_v62 = vpop.f32.mrf.mxu3 }
  0xe3   : > { %v315_v63 = vadd.f32 %v604_v32, %v314_v61  ;;  %v327_v0 = vadd.f32 %v604_v32, %v326_v62 }
  0xe5   : > { %340 = vst [vmem:[%s920_s22 + $0x58] sm:$0xff] %v315_v63 }
  0xe6   : > { %344 = vst [vmem:[%s920_s22 + $0x78] sm:$0xff] %v327_v0 }
  0xe7   : > { %692 = shalt.err (!%p689_p0)
}
  0xe8   : > { %s756_s6 = smov 128   ;;  %s757_s7 = smov 8  }
  0xe9   : > { %533 = dma.vmem_to_hbm [thread:$0]  (%p860_p5), %s361_s19, 2048, %s363_s24, %s346_s15, %s756_s6, %s756_s6, %s757_s7  }
  0xea PF: > { %s377_s1 = sand.u32 1, %s731_s12   ;;  %p544_p3 = pnand %p464_p11, %p827_p6 }
  0xeb   : > { %s378_s20 = scalar_lea.sflag [#allocation4], %s377_s1 }
  0xec   : > { %p545_p7 = pneg %p544_p3 }
  0xee   : > { %726 = dma.done.wait (%p545_p7), %s378_s20, 2048  }
  0xef   : > { %728 = vsyncadd (%p545_p7), %s378_s20, 4294965248  ;;  %s20_s17 = sadd.s32 1, %s751_s17   ;;  %s992_s12 = smov %s735_s13 }
  0xf0   : > { %p17_p9 = scmp.ge.s32.totalorder %s20_s17, 4   ;;  %s993_s13 = smov %s739_s14 }
  0xf1   : > { %s994_s14 = smov %s869_s18  ;;  %s995_s15 = smov %s747_s16 }
  0xf2   : > { %s996_s16 = smov %s998_s5  ;;  %19 = sbr.rel (!%p17_p9) target bundleno = 9 (0x9), region = 81 }
  0xf7   :  { %384 = vsyncpa [#allocation3], 1 }
  0xf8   :  { %386 = vsyncpa [#allocation3 + $0x1], 1 }
  0xf9   :  { %387 = vsyncpa [#allocation6], 1 }
  0xfa   :  { %388 = vsyncpa [#allocation4], 1 }
  0xfb   :  { %390 = vsyncpa [#allocation4 + $0x1], 1 }

// kernel: tpu_custom_call.1
= control target key start
LH: loop header
LB: loop body
LE: loop exit
PB: predicated region body
PF: predicated region fallthrough
CT: control target
= control target key end

     0   :  { %s977_s0 = inlined_call_operand.hbm [shape: f32[2,128,128], index: 0, kind: input, shape index: {}]   ;;  %s978_s1 = inlined_call_operand.hbm [shape: f32[128,128], index: 1, kind: input, shape index: {}]   ;;  %s979_s2 = inlined_call_operand.vmem [shape: f32[1,128], index: 2, kind: input, shape index: {}]   ;;  %s980_s3 = inlined_call_operand.hbm [shape: f32[2,128,128], index: 3, kind: output, shape index: {}]  }
   0x1   :  { %982 = sst [smem:[#allocation11_spill]] %s978_s1 }
   0x2   :  { %8 = vsyncpa [#allocation3], 0 }
   0x3   :  { %10 = vsyncpa [#allocation3 + $0x1], 0 }
   0x4   :  { %11 = vsyncpa [#allocation6], 0 }
   0x5   :  { %12 = vsyncpa [#allocation4], 0 }
   0x6   :  { %14 = vsyncpa [#allocation4 + $0x1], 0  ;;  %s778_s12 = smov 0   ;;  %s780_s13 = smov 0  }
   0x7   :  { %s782_s14 = smov 0   ;;  %s784_s15 = smov 0  }
   0x8   :  { %s786_s16 = smov 0   ;;  %s788_s17 = smov 0  }
   0x9 LB: > { %s460_s18 = sadd.s32 4294967295, %s751_s17   ;;  %s461_s19 = sadd.s32 4294967294, %s751_s17   ;;  %s751_s17 = sphi %s788_s17, %s20_s17   ;;  %s747_s16 = sphi %s786_s16, %s996_s16   ;;  %s743_s15 = sphi %s784_s15, %s995_s15   ;;  %s739_s14 = sphi %s782_s14, %s994_s14   ;;  %s735_s13 = sphi %s780_s13, %s993_s13   ;;  %s731_s12 = sphi %s778_s12, %s992_s12  }
   0xa   : > { %p54_p0 = scmp.ne.s32.totalorder %s735_s13, %s731_s12  ;;  %p812_p1 = scmp.eq.s32.totalorder %s460_s18, 0 }
   0xb   : > { %p816_p2 = scmp.eq.s32.totalorder %s460_s18, 1  ;;  %p128_p3 = scmp.eq.s32.totalorder %s461_s19, 1 }
   0xc   : > { %p822_p4 = por %p812_p1, %p54_p0  ;;  %p462_p5 = scmp.ge.s32.totalorder %s751_s17, 1 }
   0xd   : > { %p827_p6 = por %p128_p3, %p54_p0  ;;  %p135_p7 = scmp.lt.s32.totalorder %s751_s17, 3 }
   0xe   : > { %s987_s1 = sld [smem:[#allocation11_spill]]  ;;  %s753_s28 = smov [#allocation5]  }
   0xf   : > { %p835_p8 = pnand %p462_p5, %p135_p7  ;;  %s148_s29 = sshll.u32 %s753_s28, 4  ;;  %s149_s29 = int_to_ptr.vmem [resolvable:$true] %s148_s29 }
  0x10   : > { %p464_p11 = scmp.ge.s32.totalorder %s751_s17, 2  ;;  %s981_s30 = smov 128  }
  0x11   : > { %p535_p9 = pneg %p835_p8  ;;  %s755_s4 = smov 8  }
  0x12   : > { %s32_s5 = sadd.s32 1, %s747_s16  ;;  %s41_s6 = sadd.s32 1, %s739_s14 }
  0x13   : > { %p536_p10 = pnand %p535_p9, %p812_p1  ;;  %p34_p12 = scmp.ge.s32.totalorder %s32_s5, 2 }
  0x14   : > { %s146_s26 = sshll.u32 %s987_s1, 4  ;;  %p48_p13 = scmp.ne.s32.totalorder %s739_s14, %s735_s13  ;;  %s147_s26 = int_to_ptr.hbm [resolvable:$true] %s146_s26 }
  0x15   : > { %538 = dma.hbm_to_vmem [thread:$0]  (!%p536_p10), %s147_s26, 2048, %s149_s29, [#allocation6], %s981_s30, %s981_s30, %s755_s4  }
  0x16   : > { %p49_p0 = scmp.eq.s32.totalorder %s751_s17, 0  ;;  %s998_s5 = smov (%p34_p12, %s32_s5), 0 }
  0x17   : > { %p860_p5 = por %p816_p2, %p48_p13  ;;  %s36_s9 = ssub.s32 %s747_s16, %s998_s5 }
  0x18   : > { %p854_p3 = por %p49_p0, %p48_p13  ;;  %p548_p7 = scmp.lt.s32.totalorder %s751_s17, 2 }
  0x19   : > { %p39_p9 = scmp.eq.s32.totalorder %s36_s9, 0  ;;  %s165_s10 = sand.u32 1, %s739_s14  }
  0x1a   : > { %s465_s11 = sshll.u32 %s165_s10, 7  ;;  %s477_s19 = sshll.u32 %s747_s16, 7 }
  0x1b   : > { %s869_s18 = scalar_select %p39_p9, %s739_s14, %s41_s6  }
  0x1c   : > { %s176_s26 = scalar_lea.hbm %s977_s0, %s477_s19  ;;  %s169_s28 = scalar_lea.vmem [#allocation2], %s465_s11 }
  0x1d   : > { %s179_s29 = sshll.u32 %s169_s28, 4  ;;  %s177_s21 = sshll.u32 %s176_s26, 4  ;;  %s180_s29 = int_to_ptr.vmem [resolvable:$true] %s179_s29  ;;  %s178_s21 = int_to_ptr.hbm [resolvable:$true] %s177_s21 }
  0x1e   : > { %p540_p2 = pnand %p548_p7, %p854_p3  ;;  %s166_s30 = scalar_lea.sflag [#allocation3], %s165_s10 }
  0x1f   : > { %s991_s1 = smov 128   ;;  %191 = sbr.rel (%p835_p8) target bundleno = 234 (0xea), region = 32 }
  0x20   : > { %542 = dma.hbm_to_vmem [thread:$0]  (!%p540_p2), %s178_s21, 2048, %s180_s29, %s166_s30, %s991_s1, %s991_s1, %s755_s4  }
  0x21   : > { %s883_s6 = sand.u32 (!%p835_p8), 1, %s735_s13  }
  0x22   : > { %s469_s9 = sshll.u32 (!%p835_p8), %s883_s6, 7  ;;  %s194_s11 = scalar_lea.sflag (!%p835_p8), [#allocation3], %s883_s6 }
  0x23   : > { %s889_s7 = scalar_lea.vmem (!%p835_p8), [#allocation2], %s469_s9 }
  0x24   : > { %718 = dma.done.wait (%p822_p4), %s194_s11, 2048  }
  0x25   : > { %720 = vsyncadd (%p822_p4), %s194_s11, 4294965248 }
  0x26   : > { %722 = dma.done.wait (%p812_p1), [#allocation6], 2048  }
  0x27   : > { %724 = vsyncadd (%p812_p1), [#allocation6], 4294965248  ;;  %v259_v0 = vld [vmem:[#allocation5 + $0x78] sm:$0xff]  ;;  %v258_v1 = vld [vmem:[#allocation5 + $0x70] sm:$0xff]  ;;  %s920_s22 = scalar_lea.vmem [#allocation7], %s469_s9  ;;  %s478_s27 = sshll.u32 %s743_s15, 7 }
  0x28   : > { %480 = vmatpush.msra.mxu2 %v259_v0  ;;  %481 = vmatpush.msra.mxu3 %v259_v0  ;;  %v257_v2 = vld [vmem:[#allocation5 + $0x68] sm:$0xff]  ;;  %v256_v3 = vld [vmem:[#allocation5 + $0x60] sm:$0xff]  ;;  %v255_v4 = vld [vmem:[#allocation5 + $0x58] sm:$0xff]  ;;  %s359_s10 = scalar_lea.hbm %s980_s3, %s478_s27  ;;  %s360_s19 = sshll.u32 %s920_s22, 4  ;;  %s361_s19 = int_to_ptr.vmem [resolvable:$true] %s360_s19 }
  0x29   : > { %264 = vmatpush.msra.mxu0 %v259_v0  ;;  %479 = vmatpush.msra.mxu1 %v259_v0  ;;  %v254_v5 = vld [vmem:[#allocation5 + $0x50] sm:$0xff]  ;;  %v253_v6 = vld [vmem:[#allocation5 + $0x48] sm:$0xff]  ;;  %v252_v7 = vld [vmem:[#allocation5 + $0x40] sm:$0xff]  ;;  %s362_s24 = sshll.u32 %s359_s10, 4  ;;  %s346_s15 = scalar_lea.sflag [#allocation4], %s883_s6  ;;  %s363_s24 = int_to_ptr.hbm [resolvable:$true] %s362_s24 }
  0x2a   : > { %483 = vmatpush.msra.mxu2 %v258_v1  ;;  %484 = vmatpush.msra.mxu3 %v258_v1  ;;  %v251_v8 = vld [vmem:[#allocation5 + $0x38] sm:$0xff]  ;;  %v250_v9 = vld [vmem:[#allocation5 + $0x30] sm:$0xff]  ;;  %v249_v10 = vld [vmem:[#allocation5 + $0x28] sm:$0xff]  ;;  %s679_s25 = sshra.s32 %s363_s24, 4  ;;  %s685_s21 = scalar_lea.hbm %s980_s3, 256  ;;  %s680_s25 = int_to_ptr.hbm [resolvable:$true] %s679_s25 }
  0x2b   : > { %265 = vmatpush.msra.mxu0 %v258_v1  ;;  %482 = vmatpush.msra.mxu1 %v258_v1  ;;  %v248_v11 = vld [vmem:[#allocation5 + $0x20] sm:$0xff]  ;;  %v247_v12 = vld [vmem:[#allocation5 + $0x18] sm:$0xff]  ;;  %v246_v13 = vld [vmem:[#allocation5 + $0x10] sm:$0xff]  ;;  %s681_s26 = scalar_lea.hbm %s680_s25, 128  ;;  %p686_p10 = scmp.lt.s32.totalorder %s680_s25, %s980_s3 }
  0x2c   : > { %486 = vmatpush.msra.mxu2 %v257_v2  ;;  %487 = vmatpush.msra.mxu3 %v257_v2  ;;  %v245_v14 = vld [vmem:[#allocation5 + $0x8] sm:$0xff]  ;;  %v244_v15 = vld [vmem:[#allocation5] sm:$0xff]  ;;  %v238_v24 = vld [vmem:[%s889_s7 + $0x50] sm:$0xff]  ;;  %p682_p1 = scmp.ne.s32.totalorder %s680_s25, %s681_s26  ;;  %p687_p12 = scmp.lt.s32.totalorder %s685_s21, %s681_s26 }
  0x2d   : > { %266 = vmatpush.msra.mxu0 %v257_v2  ;;  %485 = vmatpush.msra.mxu1 %v257_v2  ;;  %v236_v16 = vld [vmem:[%s889_s7 + $0x40] sm:$0xff]  ;;  %v237_v20 = vld [vmem:[%s889_s7 + $0x48] sm:$0xff]  ;;  %v242_v25 = vld [vmem:[%s889_s7 + $0x70] sm:$0xff] }
  0x2e   : > { %489 = vmatpush.msra.mxu2 %v256_v3  ;;  %490 = vmatpush.msra.mxu3 %v256_v3  ;;  %v240_v17 = vld [vmem:[%s889_s7 + $0x60] sm:$0xff]  ;;  %v241_v21 = vld [vmem:[%s889_s7 + $0x68] sm:$0xff]  ;;  %v230_v26 = vld [vmem:[%s889_s7 + $0x10] sm:$0xff]  ;;  %p683_p4 = pnand %p682_p1, %p860_p5  ;;  %p688_p13 = por %p687_p12, %p686_p10 }
  0x2f   : > { %267 = vmatpush.msra.mxu0 %v256_v3  ;;  %488 = vmatpush.msra.mxu1 %v256_v3  ;;  %v228_v18 = vld [vmem:[%s889_s7] sm:$0xff]  ;;  %v229_v22 = vld [vmem:[%s889_s7 + $0x8] sm:$0xff]  ;;  %v234_v27 = vld [vmem:[%s889_s7 + $0x30] sm:$0xff] }
  0x30   : > { %492 = vmatpush.msra.mxu2 %v255_v4  ;;  %493 = vmatpush.msra.mxu3 %v255_v4  ;;  %v232_v19 = vld [vmem:[%s889_s7 + $0x20] sm:$0xff]  ;;  %v233_v23 = vld [vmem:[%s889_s7 + $0x28] sm:$0xff]  ;;  %v239_v28 = vld [vmem:[%s889_s7 + $0x58] sm:$0xff]  ;;  %p684_p8 = pneg %p683_p4 }
  0x31   : > { %268 = vmatpush.msra.mxu0 %v255_v4  ;;  %491 = vmatpush.msra.mxu1 %v255_v4  ;;  %v243_v29 = vld [vmem:[%s889_s7 + $0x78] sm:$0xff]  ;;  %v604_v32 = vld [vmem:[%s979_s2] ss:$0 sm:$0xff] }
  0x32   : > { %495 = vmatpush.msra.mxu2 %v254_v5  ;;  %496 = vmatpush.msra.mxu3 %v254_v5  ;;  %v231_v30 = vld [vmem:[%s889_s7 + $0x18] sm:$0xff]  ;;  %p689_p0 = pnand %p688_p13, %p684_p8 }
  0x33   : > { %269 = vmatpush.msra.mxu0 %v254_v5  ;;  %494 = vmatpush.msra.mxu1 %v254_v5  ;;  %v235_v31 = vld [vmem:[%s889_s7 + $0x38] sm:$0xff] }
  0x34   : > { %498 = vmatpush.msra.mxu2 %v253_v6  ;;  %499 = vmatpush.msra.mxu3 %v253_v6 }
  0x35   : > { %270 = vmatpush.msra.mxu0 %v253_v6  ;;  %497 = vmatpush.msra.mxu1 %v253_v6 }
  0x36   : > { %501 = vmatpush.msra.mxu2 %v252_v7  ;;  %502 = vmatpush.msra.mxu3 %v252_v7 }
  0x37   : > { %271 = vmatpush.msra.mxu0 %v252_v7  ;;  %500 = vmatpush.msra.mxu1 %v252_v7 }
  0x38   : > { %504 = vmatpush.msra.mxu2 %v251_v8  ;;  %505 = vmatpush.msra.mxu3 %v251_v8 }
  0x39   : > { %272 = vmatpush.msra.mxu0 %v251_v8  ;;  %503 = vmatpush.msra.mxu1 %v251_v8 }
  0x3a   : > { %507 = vmatpush.msra.mxu2 %v250_v9  ;;  %508 = vmatpush.msra.mxu3 %v250_v9 }
  0x3b   : > { %273 = vmatpush.msra.mxu0 %v250_v9  ;;  %506 = vmatpush.msra.mxu1 %v250_v9 }
  0x3c   : > { %510 = vmatpush.msra.mxu2 %v249_v10  ;;  %511 = vmatpush.msra.mxu3 %v249_v10 }
  0x3d   : > { %274 = vmatpush.msra.mxu0 %v249_v10  ;;  %509 = vmatpush.msra.mxu1 %v249_v10 }
  0x3e   : > { %513 = vmatpush.msra.mxu2 %v248_v11  ;;  %514 = vmatpush.msra.mxu3 %v248_v11 }
  0x3f   : > { %275 = vmatpush.msra.mxu0 %v248_v11  ;;  %512 = vmatpush.msra.mxu1 %v248_v11 }
  0x40   : > { %516 = vmatpush.msra.mxu2 %v247_v12  ;;  %517 = vmatpush.msra.mxu3 %v247_v12 }
  0x41   : > { %276 = vmatpush.msra.mxu0 %v247_v12  ;;  %515 = vmatpush.msra.mxu1 %v247_v12 }
  0x42   : > { %519 = vmatpush.msra.mxu2 %v246_v13  ;;  %520 = vmatpush.msra.mxu3 %v246_v13 }
  0x43   : > { %277 = vmatpush.msra.mxu0 %v246_v13  ;;  %518 = vmatpush.msra.mxu1 %v246_v13 }
  0x44   : > { %522 = vmatpush.msra.mxu2 %v245_v14  ;;  %523 = vmatpush.msra.mxu3 %v245_v14 }
  0x45   : > { %278 = vmatpush.msra.mxu0 %v245_v14  ;;  %521 = vmatpush.msra.mxu1 %v245_v14 }
  0x46   : > { %525 = vmatpush.msra.mxu2 %v244_v15  ;;  %526 = vmatpush.msra.mxu3 %v244_v15 }
  0x47   : > { %304 = vmatmul.f32.vlgmr.msra.gmra.mxu2 %v236_v16  ;;  %316 = vmatmul.f32.vlgmr.msra.gmra.mxu3 %v240_v17 }
  0x48   : > { %279 = vmatpush.msra.mxu0 %v244_v15  ;;  %524 = vmatpush.msra.mxu1 %v244_v15 }
  0x49   : > { %280 = vmatmul.f32.vlgmr.msra.gmra.mxu0 %v228_v18  ;;  %292 = vmatmul.f32.vlgmr.msra.gmra.mxu1 %v232_v19 }
  0x4f   : > { %307 = vmatmul.f32.gmra.mxu2 %v237_v20  ;;  %319 = vmatmul.f32.gmra.mxu3 %v241_v21 }
  0x51   : > { %283 = vmatmul.f32.gmra.mxu0 %v229_v22  ;;  %295 = vmatmul.f32.gmra.mxu1 %v233_v23 }
  0x57   : > { %310 = vmatmul.f32.gmra.mxu2 %v238_v24  ;;  %322 = vmatmul.f32.gmra.mxu3 %v242_v25 }
  0x59   : > { %286 = vmatmul.f32.gmra.mxu0 %v230_v26  ;;  %298 = vmatmul.f32.gmra.mxu1 %v234_v27 }
  0x5f   : > { %313 = vmatmul.f32.gmra.mxu2 %v239_v28  ;;  %325 = vmatmul.f32.gmra.mxu3 %v243_v29 }
  0x61   : > { %289 = vmatmul.f32.gmra.mxu0 %v231_v30  ;;  %301 = vmatmul.f32.gmra.mxu1 %v235_v31 }
  0xc6   : > { %v281_v33 = vpop.f32.mrf.mxu0  ;;  %v293_v34 = vpop.f32.mrf.mxu1 }
  0xc7   : > { %v282_v35 = vadd.f32 %v604_v32, %v281_v33  ;;  %v294_v36 = vadd.f32 %v604_v32, %v293_v34 }
  0xc9   : > { %329 = vst [vmem:[%s920_s22] sm:$0xff] %v282_v35 }
  0xca   : > { %333 = vst [vmem:[%s920_s22 + $0x20] sm:$0xff] %v294_v36  ;;  %v305_v37 = vpop.f32.mrf.mxu2  ;;  %v317_v38 = vpop.f32.mrf.mxu3 }
  0xcb   : > { %v306_v39 = vadd.f32 %v604_v32, %v305_v37  ;;  %v318_v40 = vadd.f32 %v604_v32, %v317_v38 }
  0xcd   : > { %337 = vst [vmem:[%s920_s22 + $0x40] sm:$0xff] %v306_v39 }
  0xce   : > { %341 = vst [vmem:[%s920_s22 + $0x60] sm:$0xff] %v318_v40  ;;  %v284_v41 = vpop.f32.mrf.mxu0  ;;  %v296_v42 = vpop.f32.mrf.mxu1 }
  0xcf   : > { %v285_v43 = vadd.f32 %v604_v32, %v284_v41  ;;  %v297_v44 = vadd.f32 %v604_v32, %v296_v42 }
  0xd1   : > { %330 = vst [vmem:[%s920_s22 + $0x8] sm:$0xff] %v285_v43 }
  0xd2   : > { %334 = vst [vmem:[%s920_s22 + $0x28] sm:$0xff] %v297_v44  ;;  %v308_v45 = vpop.f32.mrf.mxu2  ;;  %v320_v46 = vpop.f32.mrf.mxu3 }
  0xd3   : > { %v309_v47 = vadd.f32 %v604_v32, %v308_v45  ;;  %v321_v48 = vadd.f32 %v604_v32, %v320_v46 }
  0xd5   : > { %338 = vst [vmem:[%s920_s22 + $0x48] sm:$0xff] %v309_v47 }
  0xd6   : > { %342 = vst [vmem:[%s920_s22 + $0x68] sm:$0xff] %v321_v48  ;;  %v287_v49 = vpop.f32.mrf.mxu0  ;;  %v299_v50 = vpop.f32.mrf.mxu1 }
  0xd7   : > { %v288_v51 = vadd.f32 %v604_v32, %v287_v49  ;;  %v300_v52 = vadd.f32 %v604_v32, %v299_v50 }
  0xd9   : > { %331 = vst [vmem:[%s920_s22 + $0x10] sm:$0xff] %v288_v51 }
  0xda   : > { %335 = vst [vmem:[%s920_s22 + $0x30] sm:$0xff] %v300_v52  ;;  %v311_v53 = vpop.f32.mrf.mxu2  ;;  %v323_v54 = vpop.f32.mrf.mxu3 }
  0xdb   : > { %v312_v55 = vadd.f32 %v604_v32, %v311_v53  ;;  %v324_v56 = vadd.f32 %v604_v32, %v323_v54 }
  0xdd   : > { %339 = vst [vmem:[%s920_s22 + $0x50] sm:$0xff] %v312_v55 }
  0xde   : > { %343 = vst [vmem:[%s920_s22 + $0x70] sm:$0xff] %v324_v56  ;;  %v290_v57 = vpop.f32.mrf.mxu0  ;;  %v302_v58 = vpop.f32.mrf.mxu1 }
  0xdf   : > { %v291_v59 = vadd.f32 %v604_v32, %v290_v57  ;;  %v303_v60 = vadd.f32 %v604_v32, %v302_v58 }
  0xe1   : > { %332 = vst [vmem:[%s920_s22 + $0x18] sm:$0xff] %v291_v59 }
  0xe2   : > { %336 = vst [vmem:[%s920_s22 + $0x38] sm:$0xff] %v303_v60  ;;  %v314_v61 = vpop.f32.mrf.mxu2  ;;  %v326_v62 = vpop.f32.mrf.mxu3 }
  0xe3   : > { %v315_v63 = vadd.f32 %v604_v32, %v314_v61  ;;  %v327_v0 = vadd.f32 %v604_v32, %v326_v62 }
  0xe5   : > { %340 = vst [vmem:[%s920_s22 + $0x58] sm:$0xff] %v315_v63 }
  0xe6   : > { %344 = vst [vmem:[%s920_s22 + $0x78] sm:$0xff] %v327_v0 }
  0xe7   : > { %692 = shalt.err (!%p689_p0)
}
  0xe8   : > { %s756_s6 = smov 128   ;;  %s757_s7 = smov 8  }
  0xe9   : > { %533 = dma.vmem_to_hbm [thread:$0]  (%p860_p5), %s361_s19, 2048, %s363_s24, %s346_s15, %s756_s6, %s756_s6, %s757_s7  }
  0xea PF: > { %s377_s1 = sand.u32 1, %s731_s12   ;;  %p544_p3 = pnand %p464_p11, %p827_p6 }
  0xeb   : > { %s378_s20 = scalar_lea.sflag [#allocation4], %s377_s1 }
  0xec   : > { %p545_p7 = pneg %p544_p3 }
  0xee   : > { %726 = dma.done.wait (%p545_p7), %s378_s20, 2048  }
  0xef   : > { %728 = vsyncadd (%p545_p7), %s378_s20, 4294965248  ;;  %s20_s17 = sadd.s32 1, %s751_s17   ;;  %s992_s12 = smov %s735_s13 }
  0xf0   : > { %p17_p9 = scmp.ge.s32.totalorder %s20_s17, 4   ;;  %s993_s13 = smov %s739_s14 }
  0xf1   : > { %s994_s14 = smov %s869_s18  ;;  %s995_s15 = smov %s747_s16 }
  0xf2   : > { %s996_s16 = smov %s998_s5  ;;  %19 = sbr.rel (!%p17_p9) target bundleno = 9 (0x9), region = 81 }
  0xf7   :  { %384 = vsyncpa [#allocation3], 1 }
  0xf8   :  { %386 = vsyncpa [#allocation3 + $0x1], 1 }
  0xf9   :  { %387 = vsyncpa [#allocation6], 1 }
  0xfa   :  { %388 = vsyncpa [#allocation4], 1 }
  0xfb   :  { %390 = vsyncpa [#allocation4 + $0x1], 1 }

</bundles_post_ra>
